<compile_context>
chip_gen: v7x
topology: tpu7x:2x2x1
jax: 0.10.0
libtpu: 0.0.40
codegen_flags: <defaults>
</compile_context>

<pallas_src>
import functools
import math

import jax
import jax.numpy as jnp
from jax.experimental import pallas as pl
from jax.experimental.pallas import tpu as pltpu


def _attention_pool_kernel(h_ref, mask_ref, w_ref, o_ref,
                           m_sc, l_sc, acc_sc, *, inv_sqrt_d):
    # h_ref   : (TB, TS, D) hidden-state block, native dtype
    # mask_ref: (TB, TS)    raw attention-mask block (f32, lane-dense)
    # w_ref   : (1, D)      Linear(D, 1, bias=False) weight as a row
    # o_ref   : (TB, D)     pooled output block (written on the last S step)
    # m_sc/l_sc: (TB, 1) f32 running max / denominator; acc_sc: (TB, D) f32
    s_step = pl.program_id(1)

    @pl.when(s_step == 0)
    def _():
        m_sc[...] = jnp.full_like(m_sc, -1e30)
        l_sc[...] = jnp.zeros_like(l_sc)
        acc_sc[...] = jnp.zeros_like(acc_sc)

    h = h_ref[...]                                          # (TB, TS, D)
    w32 = w_ref[...].astype(jnp.float32)                    # (1, D)
    msk = mask_ref[...]                                     # (TB, TS)

    # scores[b, s] = (sum_d h[b,s,d] * w[d]) / sqrt(D) + (-10000 if masked)
    hw = h.astype(jnp.float32) * w32[:, None, :]            # (TB, TS, D) f32 temp
    scores = jnp.sum(hw, axis=-1) * jnp.float32(inv_sqrt_d)  # (TB, TS) lane-dense
    scores = scores + jnp.where(msk > 0, jnp.float32(0.0), jnp.float32(-10000.0))

    # online softmax over the streamed sequence axis
    m_prev = m_sc[...]                                       # (TB, 1)
    m_new = jnp.maximum(m_prev, jnp.max(scores, axis=-1, keepdims=True))
    alpha = jnp.exp(m_prev - m_new)                          # (TB, 1)
    p = jnp.exp(scores - m_new)                              # (TB, TS)
    l_sc[...] = alpha * l_sc[...] + jnp.sum(p, axis=-1, keepdims=True)
    m_sc[...] = m_new

    if h_ref.dtype == jnp.float32:
        # exact f32 path: VPU multiply + sublane reduce (keeps test bit-accurate)
        pv = jnp.sum(h * p[:, :, None], axis=1)              # (TB, D) f32
    else:
        # bf16/f16: batched MXU matmul, f32 accumulation, no block-wide upcast
        pv = jnp.einsum("bqs,bsd->bqd",
                        p.astype(h_ref.dtype)[:, None, :], h,
                        preferred_element_type=jnp.float32)[:, 0, :]   # (TB, D)
    acc_sc[...] = alpha * acc_sc[...] + pv

    @pl.when(s_step == pl.num_programs(1) - 1)
    def _():
        # exact division (correctness fix vs. approx reciprocal)
        o_ref[...] = (acc_sc[...] / l_sc[...]).astype(o_ref.dtype)


def _choose_tiles(B, S, D, itemsize):
    """Pick (tb, ts): one (tb, ts, D) H block ~2 MiB, several grid steps."""
    budget = 2 * 1024 * 1024
    if B <= 8:
        tb = B                                  # full-extent batch block (legal)
    else:
        rows = budget // max(S * D * itemsize, 1)   # full-S rows that fit budget
        rows = min(rows, max(1, B // 4))            # keep >= ~4 batch grid steps
        tb = max(8, (rows // 8) * 8)                # sublane-aligned batch tile
    ts = budget // max(tb * D * itemsize, 1)
    if ts >= S:
        ts = S                                  # full-extent sequence block
    else:
        ts = max(8, (ts // 8) * 8)              # sublane-aligned sequence tile
    return tb, ts


def attention_forward(H, mask, w):
    """H: (B, S, D), mask: (B, S), w: (D, 1) / (1, D) / (D,)  ->  (B, D)."""
    B, S, D = H.shape
    dtype = H.dtype
    itemsize = jnp.dtype(dtype).itemsize
    tb, ts = _choose_tiles(B, S, D, itemsize)

    # pad ragged batch / sequence so every grid block is fully in range
    # (padded mask entries are 0 -> treated as masked-out -> contribute nothing)
    Bp = pl.cdiv(B, tb) * tb
    Sp = pl.cdiv(S, ts) * ts
    maskf = mask.astype(jnp.float32)
    Hp, maskp = H, maskf
    if Bp != B or Sp != S:
        Hp = jnp.pad(H, ((0, Bp - B), (0, Sp - S), (0, 0)))
        maskp = jnp.pad(maskf, ((0, Bp - B), (0, Sp - S)))
    w_row = jnp.reshape(w, (1, D)).astype(dtype)

    grid = (Bp // tb, Sp // ts)

    # VMEM: double-buffered H blocks + in-kernel f32 temporaries + scratch
    h_block = tb * ts * D * itemsize
    f32_block = tb * ts * D * 4
    est = 2 * h_block + 2 * f32_block + 4 * tb * (ts + D) * 4 + (4 << 20)
    vmem_limit = int(min(32 << 20, max(est, 16 << 20)))   # safe on v5e/v6e/v7x

    cost = pl.CostEstimate(
        flops=int(4 * B * S * D),
        transcendentals=int(B * S),
        bytes_accessed=int(B * S * D * itemsize + B * S * 4 + B * D * itemsize))

    kernel = functools.partial(_attention_pool_kernel,
                               inv_sqrt_d=1.0 / math.sqrt(float(D)))

    out = pl.pallas_call(
        kernel,
        out_shape=jax.ShapeDtypeStruct((Bp, D), dtype),
        grid_spec=pltpu.PrefetchScalarGridSpec(
            num_scalar_prefetch=0,
            grid=grid,
            in_specs=[
                pl.BlockSpec((tb, ts, D), lambda b, s: (b, s, 0)),   # H block
                pl.BlockSpec((tb, ts), lambda b, s: (b, s)),         # mask block
                pl.BlockSpec((1, D), lambda b, s: (0, 0)),           # weight row
            ],
            out_specs=pl.BlockSpec((tb, D), lambda b, s: (b, 0)),    # resident over s
            scratch_shapes=[
                pltpu.VMEM((tb, 1), jnp.float32),   # running max
                pltpu.VMEM((tb, 1), jnp.float32),   # running denominator
                pltpu.VMEM((tb, D), jnp.float32),   # pooled accumulator
            ]),
        compiler_params=pltpu.CompilerParams(
            dimension_semantics=("parallel", "arbitrary"),
            vmem_limit_bytes=vmem_limit),
        cost_estimate=cost,
    )(Hp, maskp, w_row)

    return out[:B] if Bp != B else out


def attention_ref(H, mask, w):
    """Pure-JAX reference mirroring the PyTorch forward (exact f32, no MXU dots)."""
    B, S, D = H.shape
    Hf = H.astype(jnp.float32)
    wf = jnp.reshape(w, (D,)).astype(jnp.float32)
    scores = jnp.sum(Hf * wf[None, None, :], axis=-1) / math.sqrt(float(D))
    scores = scores + jnp.where(mask > 0, 0.0, -10000.0)
    probs = jax.nn.softmax(scores, axis=-1)                  # softmax over sequence
    out = jnp.sum(Hf * probs[:, :, None], axis=1)            # H^T @ probs
    return out.astype(H.dtype)


if __name__ == "__main__":
    # config.hidden_size = 16  ->  H last dim D = 2 * hidden_size = 32
    B, S, hidden = 2, 8, 16
    D = hidden * 2

    key = jax.random.PRNGKey(0)
    kH, kW = jax.random.split(key, 2)
    H = jax.random.normal(kH, (B, S, D), dtype=jnp.float32)

    # deterministic init of nn.Linear(2*hidden, 1, bias=False) weight, stored (D, 1)
    bound = 1.0 / math.sqrt(D)
    w = jax.random.uniform(kW, (D, 1), minval=-bound, maxval=bound, dtype=jnp.float32)

    # attention mask: batch 1 has two padding positions
    mask = jnp.ones((B, S), dtype=jnp.float32).at[1, S - 2:].set(0.0)

    out = jax.block_until_ready(attention_forward(H, mask, w))
    ref = attention_ref(H, mask, w)

    assert out.shape == (B, D)
    err = float(jnp.max(jnp.abs(out - ref)))
    assert jnp.allclose(out, ref, atol=1e-4, rtol=1e-4), err
    print("KERNEL_OK")
</pallas_src>

<mosaic_0001>
module attributes {stable_mosaic.version = 11 : i64} {
  func.func @_attention_pool_kernel(%arg0: i32, %arg1: i32, %arg2: memref<2x8x32xf32, #tpu.memory_space<vmem>>, %arg3: memref<2x8xf32, #tpu.memory_space<vmem>>, %arg4: memref<1x32xf32, #tpu.memory_space<vmem>>, %arg5: memref<2x32xf32, #tpu.memory_space<vmem>>, %arg6: memref<2x1xf32, #tpu.memory_space<vmem>>, %arg7: memref<2x1xf32, #tpu.memory_space<vmem>>, %arg8: memref<2x32xf32, #tpu.memory_space<vmem>>) attributes {dimension_semantics = [#tpu.dimension_semantics<parallel>, #tpu.dimension_semantics<arbitrary>], iteration_bounds = array<i64: 1, 1>, scalar_prefetch = 0 : i64, scratch_operands = 3 : i64, tpu.core_type = #tpu.core_type<tc>, window_params = [{transform_indices = @transform_0, window_bounds = array<i64: 2, 8, 32>}, {transform_indices = @transform_1, window_bounds = array<i64: 2, 8>}, {pipeline_mode = #tpu.pipeline_mode<synchronous>, transform_indices = @transform_2, window_bounds = array<i64: 1, 32>}, {transform_indices = @transform_3, window_bounds = array<i64: 2, 32>}]} {
    %c0_i32 = arith.constant 0 : i32
    %0 = arith.cmpi eq, %arg1, %c0_i32 : i32
    %1 = arith.extui %0 : i1 to i32
    %c0_i32_0 = arith.constant 0 : i32
    %2 = arith.cmpi ne, %1, %c0_i32_0 : i32
    scf.if %2 {
      %cst_28 = arith.constant -1.000000e+30 : f32
      %46 = vector.broadcast %cst_28 : f32 to vector<2x1xf32>
      %c0_29 = arith.constant 0 : index
      %c0_30 = arith.constant 0 : index
      %47 = vector.load %arg6[%c0_29, %c0_30] : memref<2x1xf32, #tpu.memory_space<vmem>>, vector<2x1xf32>
      tpu.vector_store %arg6[%c0_29, %c0_30], %46 {strides = array<i32>} : memref<2x1xf32, #tpu.memory_space<vmem>>, vector<2x1xf32>,
      %cst_31 = arith.constant 0.000000e+00 : f32
      %48 = vector.broadcast %cst_31 : f32 to vector<2x1xf32>
      %c0_32 = arith.constant 0 : index
      %c0_33 = arith.constant 0 : index
      %49 = vector.load %arg7[%c0_32, %c0_33] : memref<2x1xf32, #tpu.memory_space<vmem>>, vector<2x1xf32>
      tpu.vector_store %arg7[%c0_32, %c0_33], %48 {strides = array<i32>} : memref<2x1xf32, #tpu.memory_space<vmem>>, vector<2x1xf32>,
      %cst_34 = arith.constant 0.000000e+00 : f32
      %50 = vector.broadcast %cst_34 : f32 to vector<2x32xf32>
      %c0_35 = arith.constant 0 : index
      %c0_36 = arith.constant 0 : index
      %51 = vector.load %arg8[%c0_35, %c0_36] : memref<2x32xf32, #tpu.memory_space<vmem>>, vector<2x32xf32>
      tpu.vector_store %arg8[%c0_35, %c0_36], %50 {strides = array<i32>} : memref<2x32xf32, #tpu.memory_space<vmem>>, vector<2x32xf32>,
    } else {
    }
    %c0 = arith.constant 0 : index
    %c0_1 = arith.constant 0 : index
    %c0_2 = arith.constant 0 : index
    %3 = vector.load %arg2[%c0, %c0_1, %c0_2] : memref<2x8x32xf32, #tpu.memory_space<vmem>>, vector<2x8x32xf32>
    %c0_3 = arith.constant 0 : index
    %c0_4 = arith.constant 0 : index
    %4 = vector.load %arg4[%c0_3, %c0_4] : memref<1x32xf32, #tpu.memory_space<vmem>>, vector<1x32xf32>
    %c0_5 = arith.constant 0 : index
    %c0_6 = arith.constant 0 : index
    %5 = vector.load %arg3[%c0_5, %c0_6] : memref<2x8xf32, #tpu.memory_space<vmem>>, vector<2x8xf32>
    %6 = vector.shape_cast %4 : vector<1x32xf32> to vector<1x1x32xf32>
    %7 = vector.broadcast %6 : vector<1x1x32xf32> to vector<2x8x32xf32>
    %8 = arith.mulf %3, %7 : vector<2x8x32xf32>
    %cst = arith.constant dense<0.000000e+00> : vector<2x8xf32>
    %9 = vector.multi_reduction <add>, %8, %cst [2] : vector<2x8x32xf32> to vector<2x8xf32>
    %cst_7 = arith.constant 0.176776692 : f32
    %10 = vector.broadcast %cst_7 : f32 to vector<2x8xf32>
    %11 = arith.mulf %9, %10 : vector<2x8xf32>
    %cst_8 = arith.constant 0.000000e+00 : f32
    %12 = vector.broadcast %cst_8 : f32 to vector<2x8xf32>
    %13 = arith.cmpf ogt, %5, %12 : vector<2x8xf32>
    %cst_9 = arith.constant 0.000000e+00 : f32
    %cst_10 = arith.constant -1.000000e+04 : f32
    %14 = vector.broadcast %cst_9 : f32 to vector<2x8xf32>
    %15 = vector.broadcast %cst_10 : f32 to vector<2x8xf32>
    %16 = arith.select %13, %14, %15 : vector<2x8xi1>, vector<2x8xf32>
    %17 = arith.addf %11, %16 : vector<2x8xf32>
    %c0_11 = arith.constant 0 : index
    %c0_12 = arith.constant 0 : index
    %18 = vector.load %arg6[%c0_11, %c0_12] : memref<2x1xf32, #tpu.memory_space<vmem>>, vector<2x1xf32>
    %cst_13 = arith.constant dense<0xFF800000> : vector<2xf32>
    %19 = vector.multi_reduction <maximumf>, %17, %cst_13 [1] : vector<2x8xf32> to vector<2xf32>
    %20 = vector.shape_cast %19 : vector<2xf32> to vector<2x1xf32>
    %21 = arith.maximumf %18, %20 : vector<2x1xf32>
    %22 = arith.subf %18, %21 : vector<2x1xf32>
    %23 = math.exp %22 : vector<2x1xf32>
    %24 = vector.broadcast %21 : vector<2x1xf32> to vector<2x8xf32>
    %25 = arith.subf %17, %24 : vector<2x8xf32>
    %26 = math.exp %25 : vector<2x8xf32>
    %c0_14 = arith.constant 0 : index
    %c0_15 = arith.constant 0 : index
    %27 = vector.load %arg7[%c0_14, %c0_15] : memref<2x1xf32, #tpu.memory_space<vmem>>, vector<2x1xf32>
    %28 = arith.mulf %23, %27 : vector<2x1xf32>
    %cst_16 = arith.constant dense<0.000000e+00> : vector<2xf32>
    %29 = vector.multi_reduction <add>, %26, %cst_16 [1] : vector<2x8xf32> to vector<2xf32>
    %30 = vector.shape_cast %29 : vector<2xf32> to vector<2x1xf32>
    %31 = arith.addf %28, %30 : vector<2x1xf32>
    %c0_17 = arith.constant 0 : index
    %c0_18 = arith.constant 0 : index
    %32 = vector.load %arg7[%c0_17, %c0_18] : memref<2x1xf32, #tpu.memory_space<vmem>>, vector<2x1xf32>
    tpu.vector_store %arg7[%c0_17, %c0_18], %31 {strides = array<i32>} : memref<2x1xf32, #tpu.memory_space<vmem>>, vector<2x1xf32>,
    %c0_19 = arith.constant 0 : index
    %c0_20 = arith.constant 0 : index
    %33 = vector.load %arg6[%c0_19, %c0_20] : memref<2x1xf32, #tpu.memory_space<vmem>>, vector<2x1xf32>
    tpu.vector_store %arg6[%c0_19, %c0_20], %21 {strides = array<i32>} : memref<2x1xf32, #tpu.memory_space<vmem>>, vector<2x1xf32>,
    %34 = vector.shape_cast %26 : vector<2x8xf32> to vector<2x8x1xf32>
    %35 = vector.broadcast %34 : vector<2x8x1xf32> to vector<2x8x32xf32>
    %36 = arith.mulf %3, %35 : vector<2x8x32xf32>
    %cst_21 = arith.constant dense<0.000000e+00> : vector<2x32xf32>
    %37 = vector.multi_reduction <add>, %36, %cst_21 [1] : vector<2x8x32xf32> to vector<2x32xf32>
    %c0_22 = arith.constant 0 : index
    %c0_23 = arith.constant 0 : index
    %38 = vector.load %arg8[%c0_22, %c0_23] : memref<2x32xf32, #tpu.memory_space<vmem>>, vector<2x32xf32>
    %39 = vector.broadcast %23 : vector<2x1xf32> to vector<2x32xf32>
    %40 = arith.mulf %39, %38 : vector<2x32xf32>
    %41 = arith.addf %40, %37 : vector<2x32xf32>
    %c0_24 = arith.constant 0 : index
    %c0_25 = arith.constant 0 : index
    %42 = vector.load %arg8[%c0_24, %c0_25] : memref<2x32xf32, #tpu.memory_space<vmem>>, vector<2x32xf32>
    tpu.vector_store %arg8[%c0_24, %c0_25], %41 {strides = array<i32>} : memref<2x32xf32, #tpu.memory_space<vmem>>, vector<2x32xf32>,
    %c0_i32_26 = arith.constant 0 : i32
    %43 = arith.cmpi eq, %arg1, %c0_i32_26 : i32
    %44 = arith.extui %43 : i1 to i32
    %c0_i32_27 = arith.constant 0 : i32
    %45 = arith.cmpi ne, %44, %c0_i32_27 : i32
    scf.if %45 {
      %c0_28 = arith.constant 0 : index
      %c0_29 = arith.constant 0 : index
      %46 = vector.load %arg8[%c0_28, %c0_29] : memref<2x32xf32, #tpu.memory_space<vmem>>, vector<2x32xf32>
      %c0_30 = arith.constant 0 : index
      %c0_31 = arith.constant 0 : index
      %47 = vector.load %arg7[%c0_30, %c0_31] : memref<2x1xf32, #tpu.memory_space<vmem>>, vector<2x1xf32>
      %48 = vector.broadcast %47 : vector<2x1xf32> to vector<2x32xf32>
      %49 = arith.divf %46, %48 : vector<2x32xf32>
      %c0_32 = arith.constant 0 : index
      %c0_33 = arith.constant 0 : index
      %50 = vector.load %arg5[%c0_32, %c0_33] : memref<2x32xf32, #tpu.memory_space<vmem>>, vector<2x32xf32>
      tpu.vector_store %arg5[%c0_32, %c0_33], %49 {strides = array<i32>} : memref<2x32xf32, #tpu.memory_space<vmem>>, vector<2x32xf32>,
    } else {
    }
    return
  }
  func.func @transform_0(%arg0: i32, %arg1: i32) -> (i32, i32, i32) {
    %c0_i32 = arith.constant 0 : i32
    %c0_i32_0 = arith.constant 0 : i32
    return %arg0, %arg1, %c0_i32 : i32, i32, i32
  }
  func.func @transform_1(%arg0: i32, %arg1: i32) -> (i32, i32) {
    %c0_i32 = arith.constant 0 : i32
    return %arg0, %arg1 : i32, i32
  }
  func.func @transform_2(%arg0: i32, %arg1: i32) -> (i32, i32) {
    %c0_i32 = arith.constant 0 : i32
    %c0_i32_0 = arith.constant 0 : i32
    %c0_i32_1 = arith.constant 0 : i32
    return %c0_i32, %c0_i32_0 : i32, i32
  }
  func.func @transform_3(%arg0: i32, %arg1: i32) -> (i32, i32) {
    %c0_i32 = arith.constant 0 : i32
    %c0_i32_0 = arith.constant 0 : i32
    return %arg0, %c0_i32 : i32, i32
  }
}

</mosaic_0001>

<bundles_post_ra>
// kernel: tpu_custom_call.1
= control target key start
LH: loop header
LB: loop body
LE: loop exit
PB: predicated region body
PF: predicated region fallthrough
CT: control target
= control target key end

     0   :  { %8 = vsyncpa [#allocation6], 0  ;;  %s371_s0 = inlined_call_operand.hbm [shape: f32[2,8,32], index: 0, kind: input, shape index: {}]   ;;  %s372_s1 = inlined_call_operand.vmem [shape: f32[2,8], index: 1, kind: input, shape index: {}]   ;;  %s373_s2 = inlined_call_operand.vmem [shape: f32[1,32], index: 2, kind: input, shape index: {}]   ;;  %s374_s3 = inlined_call_operand.hbm [shape: f32[2,32], index: 3, kind: output, shape index: {}]  }
   0x1   :  { %9 = vsyncpa [#allocation7], 0  ;;  %s284_s12 = smov [#allocation5]   ;;  %s236_s16 = scalar_lea.hbm %s371_s0, 256 }
   0x2   :  { %s15_s13 = sshll.u32 %s284_s12, 4  ;;  %p237_p0 = scmp.ne.s32.totalorder %s371_s0, %s236_s16  ;;  %s16_s13 = int_to_ptr.vmem [resolvable:$true] %s15_s13 }
   0x3   :  { %p240_p1 = scmp.lt.u32.totalorder %s236_s16, %s371_s0 }
   0x5   :  { %p242_p2 = pnand %p240_p1, %p237_p0 }
   0x7   :  { %245 = shalt.err (!%p242_p2)
}
   0x8   :  { %s246_s21 = scalar_lea.vmem %s16_s13, 256  ;;  %p251_p4 = scmp.lt.s32.totalorder %s16_s13, %s16_s13 }
   0x9   :  { %p247_p3 = scmp.ne.s32.totalorder %s16_s13, %s246_s21  ;;  %p252_p5 = scmp.lt.s32.totalorder %s246_s21, %s246_s21 }
   0xb   :  { %p253_p6 = por %p252_p5, %p251_p4 }
   0xd   :  { %p254_p7 = pnand %p253_p6, %p247_p3 }
   0xf   :  { %257 = shalt.err (!%p254_p7)
}
  0x10   :  { %s285_s22 = smov 128   ;;  %s286_s23 = smov 8  }
  0x11   :  { %21 = dma.hbm_to_vmem [thread:$0]  %s371_s0, 256, %s16_s13, [#allocation6], %s285_s22, %s285_s22, %s286_s23  }
  0x12   :  { %280 = dma.done.wait [#allocation6], 256  }
  0x13   :  { %281 = vsyncadd [#allocation6], 4294967040  ;;  %v62_v0 = vlaneseq  ;;  %vm50_vm0 = vcmask 261120   ;;  %v326_v2 = vld [vmem:[#allocation5] sm:$0xff]  ;;  %v217_v3 = vld [vmem:[%s373_s2] ss:$0 sm:$0xff] }
  0x14   :  { %v331_v4 = vld [vmem:[#allocation5 + $0x8] sm:$0xff]  ;;  %v48_v6 = vmul.f32 %v217_v3, %v326_v2  ;;  %v41_v8 = vld [vmem:[%s372_s1] sm:$0x3]  ;;  %v287_v11 = vmov -10000.0   ;;  %v288_v16 = vmov 0   ;;  %vm33_vm2 = vcmask 1024  }
  0x15   :  { %v324_v1 = vshrl.u32 %v62_v0, 7  ;;  %v49_v7 = vmul.f32 %v217_v3, %v331_v4  ;;  %vm59_vm1 = vcmp.gt.f32.partialorder %v41_v8, 0.0  ;;  %226 = vset.pattern.permute.xlu0 %v288_v16  ;;  %227 = vset.pattern.permute.xlu1 %v288_v16  ;;  %v90_v17 = vand.u32 127, %v62_v0  ;;  %s291_s1 = smov [#allocation8]  }
  0x16   :  { %v51_v10 = vsel %vm50_vm0, %v48_v6, 0.0  ;;  %v60_v12 = vsel %vm59_vm1, 0.0, %v287_v11  ;;  %v289_v27 = vmov -1e+30   ;;  %vm99_vm3 = vcmask 1041409   ;;  %s208_s2 = sshll.u32 %s291_s1, 4  ;;  %s209_s2 = int_to_ptr.vmem [resolvable:$true] %s208_s2 }
  0x17   :  { %v64_v5 = vsub.s32 0, %v324_v1  ;;  %v71_v9 = vsub.s32 1, %v324_v1  ;;  %52 = vadd.xlane.f32.xlu0 %v51_v10  ;;  %v54_v14 = vsel %vm50_vm0, %v49_v7, 0.0  ;;  %v93_v18 = vsub.s32 %v90_v17, %v324_v1  ;;  %34 = vst.msk [vmem:[#allocation2] sm:$0x3] %vm33_vm2, %v289_v27  ;;  %s258_s29 = scalar_lea.vmem %s209_s2, 32  ;;  %p263_p9 = scmp.lt.s32.totalorder %s209_s2, %s209_s2 }
  0x18   :  { %vm102_vm4 = vcmask 58368   ;;  %v290_v34 = vmov 0.0   ;;  %vm36_vm5 = vcmask 254976   ;;  %p259_p8 = scmp.ne.s32.totalorder %s209_s2, %s258_s29  ;;  %p264_p10 = scmp.lt.s32.totalorder %s258_s29, %s258_s29 }
  0x19   :  { %v65_v13 = vrot.slane %v60_v12, %v64_v5  ;;  %v72_v15 = vrot.slane %v60_v12, %v71_v9  ;;  %35 = vst.msk [vmem:[#allocation3] sm:$0x3] %vm33_vm2, %v290_v34 }
  0x1a   :  { %37 = vst.msk [vmem:[#allocation4] sm:$0x3] %vm36_vm5, %v290_v34  ;;  %p265_p11 = por %p264_p10, %p263_p9 }
  0x1b   :  { %67 = vbcast.lane.b32.xlu1 %v65_v13, 256  ;;  %55 = vadd.xlane.f32.xlu0 %v54_v14 }
  0x1c   :  { %p266_p12 = pnand %p265_p11, %p259_p8 }
  0x1e   :  { %v80_v35 = vld [vmem:[#allocation2] sm:$0x3] }
  0x1f   :  { %74 = vbcast.lane.b32.xlu1 %v72_v15, 256 }
  0x20   :  { %v130_v13 = vld [vmem:[#allocation3] sm:$0x3] }
  0x21   :  { %v175_v6 = vld [vmem:[#allocation4] sm:$0x3] }
  0x8d   :  { %v68_v19 = vpop.permute.xlu1 %67 }
  0x91   :  { %v75_v24 = vpop.permute.xlu1 %74 }
  0xa4   :  { %v53_v20 = vpop.xlane.xlu0 %52 }
  0xa5   :  { %v57_v21 = vmul.f32 0.17677669, %v53_v20 }
  0xa7   :  { %v78_v22 = vadd.f32 %v68_v19, %v57_v21 }
  0xa8   :  { %v56_v23 = vpop.xlane.xlu0 %55 }
  0xa9   :  { %v58_v25 = vmul.f32 0.17677669, %v56_v23  ;;  %84 = vperm.xlu0 %226, %v78_v22  }
  0xab   :  { %v79_v26 = vadd.f32 %v75_v24, %v58_v25 }
  0xad   :  { %87 = vperm.xlu1 %227, %v79_v26  }
 0x128   :  { %v85_v28 = vpop.permute.xlu0 %84 }
 0x129   :  { %v94_v30 = vrot.slane %v85_v28, %v93_v18 }
 0x12c   :  { %v88_v29 = vpop.permute.xlu1 %87 }
 0x12d   :  { %v98_v31 = vrot.slane %v88_v29, %v93_v18 }
 0x12f   :  { %v100_v32 = vsel %vm99_vm3, %v98_v31, %v94_v30 }
 0x130   :  { %v103_v33 = vsel %vm102_vm4, %v100_v32, -inf }
 0x131   :  { %104 = vmax.xlane.f32.xlu1 %v103_v33 }
 0x1be   :  { %v105_v36 = vpop.xlane.xlu1 %104 }
 0x1bf   :  { %v106_v37 = vmax.f32 %v80_v35, %v105_v36 }
 0x1c1   :  { %v107_v38 = vsub.f32 %v80_v35, %v106_v37  ;;  %156 = vst.msk [vmem:[#allocation2] sm:$0x3] %vm33_vm2, %v106_v37  ;;  %112 = vperm.xlu1 %227, %v106_v37  }
 0x1c3   :  { %v108_v39 = vmul.f32 1.442695, %v107_v38 }
 0x1c5   :  { %228 = vpow2.f32 %v108_v39 }
 0x1cf   :  { %v229_v40 = vpop.eup %228 }
 0x1d0   :  { %178 = vperm.xlu1 %227, %v229_v40   ;;  %v131_v14 = vmul.f32 %v229_v40, %v130_v13 }
 0x240   :  { %v113_v41 = vpop.permute.xlu1 %112 }
 0x241   :  { %v117_v42 = vrot.slane %v113_v41, %v64_v5  ;;  %v121_v43 = vrot.slane %v113_v41, %v71_v9 }
 0x243   :  { %v124_v44 = vsub.f32 %v78_v22, %v117_v42  ;;  %v125_v45 = vsub.f32 %v79_v26, %v121_v43 }
 0x245   :  { %v126_v46 = vmul.f32 1.442695, %v124_v44  ;;  %v128_v47 = vmul.f32 1.442695, %v125_v45 }
 0x247   :  { %230 = vpow2.f32 %v126_v46 }
 0x248   :  { %232 = vpow2.f32 %v128_v47 }
 0x24f   :  { %v179_v7 = vpop.permute.xlu1 %178 }
 0x250   :  { %v181_v10 = vmul.f32 %v179_v7, %v175_v6 }
 0x251   :  { %v231_v48 = vpop.eup %230 }
 0x252   :  { %135 = vperm.xlu0 %226, %v231_v48   ;;  %v233_v49 = vpop.eup %232 }
 0x256   :  { %138 = vperm.xlu0 %226, %v233_v49  }
 0x2d1   :  { %v136_v50 = vpop.permute.xlu0 %135 }
 0x2d2   :  { %v159_v51 = vmul.f32 %v136_v50, %v326_v2  ;;  %v143_v55 = vrot.slane %v136_v50, %v93_v18 }
 0x2d4   :  { %v161_v52 = vsel %vm50_vm0, %v159_v51, 0.0 }
 0x2d5   :  { %v162_v53 = vrot.slane %v161_v52, 4  ;;  %v139_v54 = vpop.permute.xlu0 %138 }
 0x2d6   :  { %v147_v56 = vrot.slane %v139_v54, %v93_v18  ;;  %v160_v57 = vmul.f32 %v139_v54, %v331_v4 }
 0x2d7   :  { %v163_v58 = vadd.f32 %v162_v53, %v161_v52 }
 0x2d8   :  { %v168_v59 = vsel %vm50_vm0, %v160_v57, 0.0  ;;  %v148_v60 = vsel %vm99_vm3, %v147_v56, %v143_v55 }
 0x2d9   :  { %v164_v61 = vrot.slane %v163_v58, 2  ;;  %v169_v62 = vrot.slane %v168_v59, 4  ;;  %v150_v63 = vsel %vm102_vm4, %v148_v60, 0.0 }
 0x2da   :  { %151 = vadd.xlane.f32.xlu0 %v150_v63 }
 0x2db   :  { %v165_v0 = vadd.f32 %v164_v61, %v163_v58  ;;  %v170_v1 = vadd.f32 %v169_v62, %v168_v59 }
 0x2dd   :  { %v171_v2 = vrot.slane %v170_v1, 2  ;;  %v166_v3 = vrot.slane %v165_v0, 1 }
 0x2df   :  { %v172_v5 = vadd.f32 %v171_v2, %v170_v1  ;;  %v167_v9 = vadd.f32 %v166_v3, %v165_v0 }
 0x2e1   :  { %v173_v8 = vrot.slane %v172_v5, 1 }
 0x2e3   :  { %v174_v4 = vadd.f32 %v173_v8, %v172_v5 }
 0x2e5   :  { %v184_v11 = vsel %vm99_vm3, %v174_v4, %v167_v9 }
 0x2e6   :  { %v186_v12 = vadd.f32 %v184_v11, %v181_v10 }
 0x2e8   :  { %188 = vst.msk [vmem:[#allocation4] sm:$0x3] %vm36_vm5, %v186_v12 }
 0x2ef   :  { %v192_v20 = vld [vmem:[#allocation4] sm:$0x3] }
 0x367   :  { %v152_v15 = vpop.xlane.xlu0 %151 }
 0x368   :  { %v153_v16 = vadd.f32 %v152_v15, %v131_v14 }
 0x36a   :  { %155 = vst.msk [vmem:[#allocation3] sm:$0x3] %vm33_vm2, %v153_v16 }
 0x371   :  { %v193_v17 = vld [vmem:[#allocation3] sm:$0x3] }
 0x372   :  { %196 = vperm.xlu1 %227, %v193_v17  }
 0x3f1   :  { %v197_v18 = vpop.permute.xlu1 %196 }
 0x3f2   :  { %234 = vrcp.f32 %v197_v18 }
 0x3fc   :  { %v235_v19 = vpop.eup %234 }
 0x3fd   :  { %v200_v21 = vmul.f32 %v235_v19, %v192_v20 }
 0x3ff   :  { %201 = vst.msk [vmem:[#allocation8] sm:$0x3] %vm36_vm5, %v200_v21 }
 0x400   :  { %269 = shalt.err (!%p266_p12)
}
 0x401   :  { %s270_s5 = scalar_lea.hbm %s374_s3, 32 }
 0x402   :  { %p271_p13 = scmp.ne.s32.totalorder %s374_s3, %s270_s5  ;;  %p274_p0 = scmp.lt.u32.totalorder %s270_s5, %s374_s3 }
 0x404   :  { %p276_p1 = pnand %p274_p0, %p271_p13 }
 0x406   :  { %279 = shalt.err (!%p276_p1)
}
 0x407   :  { %211 = dma.vmem_to_hbm [thread:$0]  %s209_s2, 32, %s374_s3, [#allocation7]  }
 0x408   :  { %282 = dma.done.wait [#allocation7], 32  }
 0x409   :  { %283 = vsyncadd [#allocation7], 4294967264 }
 0x40a   :  { %215 = vsyncpa [#allocation6], 1 }
 0x40b   :  { %216 = vsyncpa [#allocation7], 1 }

</bundles_post_ra>
